<compile_context>
chip_gen: v7x
topology: tpu7x:2x2x1
jax: 0.10.0
libtpu: 0.0.40
codegen_flags: <defaults>
</compile_context>

<pallas_src>
import jax
import jax.numpy as jnp
from jax.experimental import pallas as pl
from jax.experimental.pallas import tpu as pltpu


# ---------------------------------------------------------------------------
# Fused forward kernel (gate-table gather @ t=0 -> stacked LSTM cells -> linear)
# ---------------------------------------------------------------------------
def make_fused_kernel(num_layers: int, hidden_dim: int, batch: int):
    H = hidden_dim

    def kernel(tok_ref, table_ref, *refs):
        # refs = (w_ih_t_1, b_1, ..., w_ih_t_{L-1}, b_{L-1},
        #         tag_w_t_pad, tag_b_pad, out, g0_scratch)
        n_mid = 2 * (num_layers - 1)
        layer_refs = refs[:n_mid]
        tag_w_ref, tag_b_ref, out_ref, g0_ref = refs[n_mid:]

        # ---- layer-0 gates: gather precomputed (E @ W_ih0^T + b0) rows ------
        # tok_ref is SMEM (1, batch); table_ref is VMEM (vocab, 4H).
        # Row writes into a VMEM scratch (no concat / XLU shuffles).
        for b in range(batch):
            g0_ref[pl.ds(b, 1), :] = table_ref[pl.ds(tok_ref[0, b], 1), :]
        gates = g0_ref[...]                            # (batch, 4H)

        # ---- LSTM cell at t=0 with zero initial state ------------------------
        # PyTorch gate order [i, f, g, o]. h_{-1}=c_{-1}=0 =>
        #   c_0 = i * g   (f * c_{-1} == 0),  h_0 = o * tanh(c_0)
        def cell(gates):
            sg = jax.nn.sigmoid(gates)                 # full 128-lane vreg (EUP)
            th = jnp.tanh(gates)                       # full 128-lane vreg (EUP)
            i = sg[:, 0 * H:1 * H]
            g = th[:, 2 * H:3 * H]
            o = sg[:, 3 * H:4 * H]
            c = i * g
            return o * jnp.tanh(c)                     # h_0 of this layer

        h = cell(gates)

        # ---- layers 1..L-1 (h_{-1}=0 => only the input projection matters) ---
        for l in range(num_layers - 1):
            w_ref = layer_refs[2 * l]                  # (H, 4H)
            b_ref = layer_refs[2 * l + 1]              # (1, 4H)
            gates = jnp.dot(h, w_ref[...],
                            preferred_element_type=jnp.float32) + b_ref[...]
            h = cell(gates)

        # ---- tag linear on outputs[0]; lane-dense padded store ---------------
        out_ref[...] = (jnp.dot(h, tag_w_ref[...],
                                preferred_element_type=jnp.float32)
                        + tag_b_ref[...])

    return kernel


def sample_model_forward(params, input_tokens):
    """input_tokens: (seq, batch) int -> logits (batch, num_classes) float32."""
    seq, batch = input_tokens.shape
    num_layers = len(params["lstm"])
    hidden_dim = params["lstm"][0]["w_ih_t"].shape[1] // 4
    num_classes = params["tag_w_t"].shape[1]
    vocab = params["embedding"].shape[0]
    c_pad = ((num_classes + 127) // 128) * 128         # lane-dense output width

    # Only timestep 0 can affect outputs[0]; clamp ids (no VMEM bounds check).
    tok0 = jnp.clip(input_tokens[0].astype(jnp.int32), 0, vocab - 1)
    tok0 = tok0.reshape(1, batch)

    # Fold embedding + layer-0 input projection + bias into one gate table.
    # One-time tiny matmul outside the kernel (done in full f32 for fidelity).
    gate_table0 = (jnp.dot(params["embedding"], params["lstm"][0]["w_ih_t"],
                           precision=jax.lax.Precision.HIGHEST)
                   + params["lstm"][0]["b"])           # (vocab, 4H)

    layer_args = []
    for layer in params["lstm"][1:]:
        layer_args += [layer["w_ih_t"], layer["b"]]

    # Zero-pad the tag head to a 128-lane output block.
    tag_w_p = jnp.zeros((hidden_dim, c_pad), jnp.float32)
    tag_w_p = tag_w_p.at[:, :num_classes].set(params["tag_w_t"])
    tag_b_p = jnp.zeros((1, c_pad), jnp.float32)
    tag_b_p = tag_b_p.at[:, :num_classes].set(params["tag_b"])

    vmem = pl.BlockSpec(memory_space=pltpu.MemorySpace.VMEM)
    smem = pl.BlockSpec(memory_space=pltpu.MemorySpace.SMEM)

    out_pad = pl.pallas_call(
        make_fused_kernel(num_layers, hidden_dim, batch),
        out_shape=jax.ShapeDtypeStruct((batch, c_pad), jnp.float32),
        in_specs=[smem, vmem] + [vmem] * (2 * (num_layers - 1)) + [vmem, vmem],
        out_specs=vmem,
        scratch_shapes=[pltpu.VMEM((batch, 4 * hidden_dim), jnp.float32)],
        # grid=() : single invocation, everything resident in VMEM.
    )(tok0, gate_table0, *layer_args, tag_w_p, tag_b_p)

    return out_pad[:, :num_classes]


# ---------------------------------------------------------------------------
# Parameter init (deterministic, PyTorch-like scales and parameterization).
# ---------------------------------------------------------------------------
def init_params(key, vocab_size, embedding_dim, hidden_dim, num_layers, num_classes):
    n_keys = 1 + 4 * num_layers + 2
    keys = list(jax.random.split(key, n_keys))
    ki = iter(keys)

    params = {}
    # nn.Embedding: N(0, 1)
    params["embedding"] = jax.random.normal(
        next(ki), (vocab_size, embedding_dim), dtype=jnp.float32)

    # nn.LSTM: uniform(-1/sqrt(H), 1/sqrt(H)); gate order [i, f, g, o]
    k = 1.0 / jnp.sqrt(hidden_dim)
    layers = []
    for layer in range(num_layers):
        in_dim = embedding_dim if layer == 0 else hidden_dim
        w_ih = jax.random.uniform(next(ki), (4 * hidden_dim, in_dim),
                                  minval=-k, maxval=k, dtype=jnp.float32)
        w_hh = jax.random.uniform(next(ki), (4 * hidden_dim, hidden_dim),
                                  minval=-k, maxval=k, dtype=jnp.float32)
        b_ih = jax.random.uniform(next(ki), (4 * hidden_dim,),
                                  minval=-k, maxval=k, dtype=jnp.float32)
        b_hh = jax.random.uniform(next(ki), (4 * hidden_dim,),
                                  minval=-k, maxval=k, dtype=jnp.float32)
        layers.append({
            "w_ih_t": w_ih.T,                      # (in_dim, 4H)
            # w_hh is part of nn.LSTM's state but provably cannot affect
            # outputs[0] (h_{-1} = 0), so the fused kernel does not consume it.
            "w_hh_t": w_hh.T,                      # (H, 4H)   [unused by kernel]
            "b": (b_ih + b_hh).reshape(1, -1),     # (1, 4H) = b_ih + b_hh
        })
    params["lstm"] = layers

    # nn.Linear(hidden_dim, num_classes): uniform(-1/sqrt(in), 1/sqrt(in))
    kl = 1.0 / jnp.sqrt(hidden_dim)
    w_tag = jax.random.uniform(next(ki), (num_classes, hidden_dim),
                               minval=-kl, maxval=kl, dtype=jnp.float32)
    b_tag = jax.random.uniform(next(ki), (num_classes,),
                               minval=-kl, maxval=kl, dtype=jnp.float32)
    params["tag_w_t"] = w_tag.T                    # (hidden, num_classes)
    params["tag_b"] = b_tag.reshape(1, -1)         # (1, num_classes)
    return params


if __name__ == "__main__":
    vocab_size, embedding_dim, hidden_dim = 50, 32, 32
    num_layers, num_classes = 2, 5
    seq, batch = 8, 2

    key = jax.random.PRNGKey(0)
    pkey, tkey = jax.random.split(key)
    params = init_params(pkey, vocab_size, embedding_dim, hidden_dim,
                         num_layers, num_classes)
    input_tokens = jax.random.randint(tkey, (seq, batch), 0, vocab_size,
                                      dtype=jnp.int32)

    # jit the wrapper so the one-time table fold / padding / final slice are
    # compiled alongside the kernel dispatch (amortizes per-call overhead).
    forward = jax.jit(sample_model_forward)
    out = forward(params, input_tokens)
    out = jax.block_until_ready(out)
    assert out.shape == (batch, num_classes), out.shape
    assert out.dtype == jnp.float32
    # TODO(synk): BaseModel.save/load (torch.save file I/O) has no Pallas
    # equivalent and is intentionally not modeled.
    print("KERNEL_OK")
</pallas_src>

<mosaic_0001>
module attributes {stable_mosaic.version = 11 : i64} {
  func.func @kernel(%arg0: memref<1x2xi32, #tpu.memory_space<smem>>, %arg1: memref<50x128xf32, #tpu.memory_space<vmem>>, %arg2: memref<32x128xf32, #tpu.memory_space<vmem>>, %arg3: memref<1x128xf32, #tpu.memory_space<vmem>>, %arg4: memref<32x128xf32, #tpu.memory_space<vmem>>, %arg5: memref<1x128xf32, #tpu.memory_space<vmem>>, %arg6: memref<2x128xf32, #tpu.memory_space<vmem>>, %arg7: memref<2x128xf32, #tpu.memory_space<vmem>>) attributes {dimension_semantics = [], scalar_prefetch = 0 : i64, scratch_operands = 1 : i64, tpu.core_type = #tpu.core_type<tc>} {
    %c0 = arith.constant 0 : index
    %c0_0 = arith.constant 0 : index
    %0 = memref.load %arg0[%c0, %c0_0] : memref<1x2xi32, #tpu.memory_space<smem>>
    %1 = arith.index_cast %0 : i32 to index
    %c0_1 = arith.constant 0 : index
    %2 = vector.load %arg1[%1, %c0_1] : memref<50x128xf32, #tpu.memory_space<vmem>>, vector<1x128xf32>
    %c0_2 = arith.constant 0 : index
    %c0_3 = arith.constant 0 : index
    %3 = vector.load %arg7[%c0_2, %c0_3] : memref<2x128xf32, #tpu.memory_space<vmem>>, vector<1x128xf32>
    tpu.vector_store %arg7[%c0_2, %c0_3], %2 {strides = array<i32>} : memref<2x128xf32, #tpu.memory_space<vmem>>, vector<1x128xf32>,
    %c0_4 = arith.constant 0 : index
    %c1 = arith.constant 1 : index
    %4 = memref.load %arg0[%c0_4, %c1] : memref<1x2xi32, #tpu.memory_space<smem>>
    %5 = arith.index_cast %4 : i32 to index
    %c0_5 = arith.constant 0 : index
    %6 = vector.load %arg1[%5, %c0_5] : memref<50x128xf32, #tpu.memory_space<vmem>>, vector<1x128xf32>
    %c1_6 = arith.constant 1 : index
    %c0_7 = arith.constant 0 : index
    %7 = vector.load %arg7[%c1_6, %c0_7] : memref<2x128xf32, #tpu.memory_space<vmem>>, vector<1x128xf32>
    tpu.vector_store %arg7[%c1_6, %c0_7], %6 {strides = array<i32>} : memref<2x128xf32, #tpu.memory_space<vmem>>, vector<1x128xf32>,
    %c0_8 = arith.constant 0 : index
    %c0_9 = arith.constant 0 : index
    %8 = vector.load %arg7[%c0_8, %c0_9] : memref<2x128xf32, #tpu.memory_space<vmem>>, vector<2x128xf32>
    %9 = arith.negf %8 : vector<2x128xf32>
    %10 = math.exp %9 : vector<2x128xf32>
    %cst = arith.constant 1.000000e+00 : f32
    %11 = vector.broadcast %cst : f32 to vector<2x128xf32>
    %12 = arith.addf %11, %10 : vector<2x128xf32>
    %13 = arith.divf %11, %12 : vector<2x128xf32>
    %14 = math.tanh %8 : vector<2x128xf32>
    %15 = vector.extract_strided_slice %13 {offsets = [0, 0], sizes = [2, 32], strides = [1, 1]} : vector<2x128xf32> to vector<2x32xf32>
    %16 = vector.extract_strided_slice %14 {offsets = [0, 64], sizes = [2, 32], strides = [1, 1]} : vector<2x128xf32> to vector<2x32xf32>
    %17 = vector.extract_strided_slice %13 {offsets = [0, 96], sizes = [2, 32], strides = [1, 1]} : vector<2x128xf32> to vector<2x32xf32>
    %18 = arith.mulf %15, %16 : vector<2x32xf32>
    %19 = math.tanh %18 : vector<2x32xf32>
    %20 = arith.mulf %17, %19 : vector<2x32xf32>
    %c0_10 = arith.constant 0 : index
    %c0_11 = arith.constant 0 : index
    %21 = vector.load %arg2[%c0_10, %c0_11] : memref<32x128xf32, #tpu.memory_space<vmem>>, vector<32x128xf32>
    %cst_12 = arith.constant dense<0.000000e+00> : vector<2x128xf32>
    %22 = tpu.matmul %20, %21, %cst_12 {dimension_numbers = #tpu.dot_dimension_numbers<[1], [0], [0], [1], [0, 0, 1, 1], [], []>} : vector<2x32xf32>, vector<32x128xf32>, vector<2x128xf32> -> vector<2x128xf32>
    %c0_13 = arith.constant 0 : index
    %c0_14 = arith.constant 0 : index
    %23 = vector.load %arg3[%c0_13, %c0_14] : memref<1x128xf32, #tpu.memory_space<vmem>>, vector<1x128xf32>
    %24 = vector.broadcast %23 : vector<1x128xf32> to vector<2x128xf32>
    %25 = arith.addf %22, %24 : vector<2x128xf32>
    %26 = arith.negf %25 : vector<2x128xf32>
    %27 = math.exp %26 : vector<2x128xf32>
    %cst_15 = arith.constant 1.000000e+00 : f32
    %28 = vector.broadcast %cst_15 : f32 to vector<2x128xf32>
    %29 = arith.addf %28, %27 : vector<2x128xf32>
    %30 = arith.divf %28, %29 : vector<2x128xf32>
    %31 = math.tanh %25 : vector<2x128xf32>
    %32 = vector.extract_strided_slice %30 {offsets = [0, 0], sizes = [2, 32], strides = [1, 1]} : vector<2x128xf32> to vector<2x32xf32>
    %33 = vector.extract_strided_slice %31 {offsets = [0, 64], sizes = [2, 32], strides = [1, 1]} : vector<2x128xf32> to vector<2x32xf32>
    %34 = vector.extract_strided_slice %30 {offsets = [0, 96], sizes = [2, 32], strides = [1, 1]} : vector<2x128xf32> to vector<2x32xf32>
    %35 = arith.mulf %32, %33 : vector<2x32xf32>
    %36 = math.tanh %35 : vector<2x32xf32>
    %37 = arith.mulf %34, %36 : vector<2x32xf32>
    %c0_16 = arith.constant 0 : index
    %c0_17 = arith.constant 0 : index
    %38 = vector.load %arg4[%c0_16, %c0_17] : memref<32x128xf32, #tpu.memory_space<vmem>>, vector<32x128xf32>
    %cst_18 = arith.constant dense<0.000000e+00> : vector<2x128xf32>
    %39 = tpu.matmul %37, %38, %cst_18 {dimension_numbers = #tpu.dot_dimension_numbers<[1], [0], [0], [1], [0, 0, 1, 1], [], []>} : vector<2x32xf32>, vector<32x128xf32>, vector<2x128xf32> -> vector<2x128xf32>
    %c0_19 = arith.constant 0 : index
    %c0_20 = arith.constant 0 : index
    %40 = vector.load %arg5[%c0_19, %c0_20] : memref<1x128xf32, #tpu.memory_space<vmem>>, vector<1x128xf32>
    %41 = vector.broadcast %40 : vector<1x128xf32> to vector<2x128xf32>
    %42 = arith.addf %39, %41 : vector<2x128xf32>
    %c0_21 = arith.constant 0 : index
    %c0_22 = arith.constant 0 : index
    %43 = vector.load %arg6[%c0_21, %c0_22] : memref<2x128xf32, #tpu.memory_space<vmem>>, vector<2x128xf32>
    tpu.vector_store %arg6[%c0_21, %c0_22], %42 {strides = array<i32>} : memref<2x128xf32, #tpu.memory_space<vmem>>, vector<2x128xf32>,
    return
  }
}

</mosaic_0001>

<bundles_post_ra>
// kernel: sample_model_forward.1
= control target key start
LH: loop header
LB: loop body
LE: loop exit
PB: predicated region body
PF: predicated region fallthrough
CT: control target
= control target key end

     0   :  { %11 = vsyncpa [#allocation5], 0  ;;  %s488_s0 = inlined_call_operand.vmem [shape: s32[1,2], index: 0, kind: input, shape index: {}]   ;;  %s489_s1 = inlined_call_operand.vmem [shape: f32[50,128], index: 1, kind: input, shape index: {}]   ;;  %s490_s2 = inlined_call_operand.vmem [shape: f32[32,128], index: 2, kind: input, shape index: {}]   ;;  %s491_s3 = inlined_call_operand.vmem [shape: f32[1,128], index: 3, kind: input, shape index: {}]   ;;  %s492_s4 = inlined_call_operand.vmem [shape: f32[32,128], index: 4, kind: input, shape index: {}]   ;;  %s493_s5 = inlined_call_operand.vmem [shape: f32[1,128], index: 5, kind: input, shape index: {}]   ;;  %s494_s6 = inlined_call_operand.hbm [shape: f32[2,128], index: 6, kind: output, shape index: {}]  }
   0x1   :  { %12 = vsyncpa [#allocation4], 0  ;;  %s19_s23 = sshll.u32 %s488_s0, 4  ;;  %s20_s23 = int_to_ptr.vmem [resolvable:$true] %s19_s23 }
   0x2   :  { %s348_s24 = scalar_lea.vmem %s20_s23, 16  ;;  %p353_p1 = scmp.lt.s32.totalorder %s20_s23, %s20_s23 }
   0x3   :  { %p349_p0 = scmp.ne.s32.totalorder %s20_s23, %s348_s24  ;;  %p354_p2 = scmp.lt.s32.totalorder %s348_s24, %s348_s24 }
   0x5   :  { %p355_p3 = por %p354_p2, %p353_p1 }
   0x7   :  { %p356_p4 = pnand %p355_p3, %p349_p0 }
   0x9   :  { %359 = shalt.err (!%p356_p4)
}
   0xa   :  { %s386_s25 = smov [#allocation3]  }
   0xb   :  { %22 = dma.vmem_to_smem %s20_s23, 16, %s386_s25, [#allocation5]  }
   0xc   :  { %382 = dma.done.wait [#allocation5], 16  }
   0xd   :  { %383 = vsyncadd [#allocation5], 4294967280 }
   0xe   :  { %36 = sfence }
   0xf   :  { %s37_s26 = sld [smem:[#allocation3]]  ;;  %s273_s27 = sld [smem:[#allocation3 + $0x1]]  ;;  %v64_v10 = vld [vmem:[%s490_s2] sm:$0xff]  ;;  %v65_v11 = vld [vmem:[%s490_s2 + $0x8] sm:$0xff]  ;;  %v66_v12 = vld [vmem:[%s490_s2 + $0x10] sm:$0xff]  ;;  %v388_v13 = vmov 0.0|0.0  }
  0x10   :  { %s387_s9 = smov 64   ;;  %312 = vmatprep.subr.bf16.mxu0 %v388_v13  ;;  %v313_v14 = vpack.c.bf16 %v65_v11, %v64_v10  ;;  %v67_v15 = vld [vmem:[%s490_s2 + $0x18] sm:$0xff]  ;;  %vm389_vm0 = vmmov 0   ;;  %v390_v16 = vmov 0.0   ;;  %318 = vmatprep.subr.bf16.mxu1 %v388_v13  ;;  %s391_s17 = smov 96   ;;  %vm78_vm1 = vcmask 261120  }
  0x11   :  { %298 = vmatprep.mubr.msk.f32.mxu0 %vm389_vm0, %v390_v16  ;;  %309 = vmatprep.mubr.msk.f32.mxu1 %vm389_vm0, %v390_v16  ;;  %v316_v17 = vpack.c.bf16 %v67_v15, %v66_v12  ;;  %s392_s18 = smov 32   ;;  %v275_v22 = vld [vmem:[%s491_s3] ss:$0 sm:$0xff]  ;;  %v170_v34 = vld [vmem:[%s492_s4 + $0x8] sm:$0xff]  ;;  %v171_v35 = vld [vmem:[%s492_s4 + $0x10] sm:$0xff]  ;;  %s393_s29 = smov [#allocation6]  }
  0x12   :  { %314 = vmatpush3.bf16.msra.mxu0 %v313_v14  ;;  %v169_v33 = vld [vmem:[%s492_s4] sm:$0xff]  ;;  %v172_v37 = vld [vmem:[%s492_s4 + $0x18] sm:$0xff]  ;;  %s262_s4 = sshll.u32 %s393_s29, 4  ;;  %s263_s4 = int_to_ptr.vmem [resolvable:$true] %s262_s4 }
  0x13   :  { %315 = vmatprep.subr.bf16.mxu0 %v388_v13  ;;  %v319_v36 = vpack.c.bf16 %v170_v34, %v169_v33  ;;  %v322_v38 = vpack.c.bf16 %v172_v37, %v171_v35  ;;  %v278_v43 = vld [vmem:[%s493_s5] ss:$0 sm:$0xff]  ;;  %p365_p6 = scmp.lt.s32.totalorder %s263_s4, %s263_s4 }
  0x15   :  { %s38_s30 = scalar_lea.vmem %s489_s1, %s37_s26  ;;  %s42_s8 = scalar_lea.vmem %s489_s1, %s273_s27  ;;  %320 = vmatpush3.bf16.msra.mxu1 %v319_v36 }
  0x16   :  { %v39_v0 = vld [vmem:[%s38_s30] sm:$0x1]  ;;  %317 = vmatpush3.bf16.msra.mxu0 %v316_v17  ;;  %321 = vmatprep.subr.bf16.mxu1 %v388_v13  ;;  %s360_s30 = scalar_lea.vmem %s263_s4, 32 }
  0x17   :  { %v43_v1 = vld [vmem:[%s42_s8] sm:$0x1]  ;;  %40 = vst [vmem:[#allocation2] sm:$0x1] %v39_v0  ;;  %p361_p5 = scmp.ne.s32.totalorder %s263_s4, %s360_s30  ;;  %p366_p7 = scmp.lt.s32.totalorder %s360_s30, %s360_s30 }
  0x18   :  { %44 = vst [vmem:[#allocation2 + $0x1] sm:$0x1] %v43_v1 }
  0x19   :  { %323 = vmatpush3.bf16.msra.mxu1 %v322_v38  ;;  %p367_p8 = por %p366_p7, %p365_p6 }
  0x1b   :  { %p368_p9 = pnand %p367_p8, %p361_p5 }
  0x1f   :  { %v45_v2 = vld [vmem:[#allocation2] sm:$0x3] }
  0x20   :  { %332 = vtanh.f32 %v45_v2  ;;  %v274_v4 = vmul.f32 -1.442695, %v45_v2 }
  0x22   :  { %334 = vpow2.f32 %v274_v4 }
  0x2a   :  { %v333_v3 = vpop.eup %332 }
  0x2b   :  { %54 = vrot.lane.b32.xlu0 %v333_v3, %s387_s9 }
  0x2c   :  { %v335_v5 = vpop.eup %334 }
  0x2d   :  { %v49_v6 = vadd.f32 1.0, %v335_v5 }
  0x2f   :  { %336 = vrcp.f32 %v49_v6 }
  0x39   :  { %v337_v7 = vpop.eup %336 }
  0x9d   :  { %v55_v8 = vpop.permute.xlu0 %54 }
  0x9e   :  { %v57_v9 = vmul.f32 %v337_v7, %v55_v8 }
  0xa0   :  { %338 = vtanh.f32 %v57_v9 }
  0xaa   :  { %v339_v18 = vpop.eup %338 }
  0xab   :  { %60 = vrot.lane.b32.xlu0 %v339_v18, %s391_s17 }
 0x11d   :  { %v61_v19 = vpop.permute.xlu0 %60 }
 0x11e   :  { %v63_v20 = vmul.f32 %v337_v7, %v61_v19 }
 0x120   :  { %76 = vrot.lane.b32.xlu1 %v63_v20, %s392_s18 }
 0x192   :  { %v77_v21 = vpop.permute.xlu1 %76 }
 0x193   :  { %299 = vmatmul.mubr.msk.f32.vlgmr.msra.gmra.mrb[0].mxu0 %vm78_vm1, %v77_v21 }
 0x266   :  { %v147_v23 = vpop.f32.mrb[0].mxu0 }
 0x267   :  { %v148_v24 = vadd.f32 %v275_v22, %v147_v23  ;;  %v300_v25 = vpop.f32.mrb[1].mxu0 }
 0x269   :  { %340 = vtanh.f32 %v148_v24  ;;  %v277_v27 = vmul.f32 -1.442695, %v148_v24 }
 0x26b   :  { %342 = vpow2.f32 %v277_v27 }
 0x273   :  { %v341_v26 = vpop.eup %340 }
 0x274   :  { %159 = vrot.lane.b32.xlu1 %v341_v26, %s387_s9 }
 0x275   :  { %v343_v28 = vpop.eup %342 }
 0x276   :  { %v154_v29 = vadd.f32 1.0, %v343_v28 }
 0x278   :  { %344 = vrcp.f32 %v154_v29 }
 0x282   :  { %v345_v30 = vpop.eup %344 }
 0x2e6   :  { %v160_v31 = vpop.permute.xlu1 %159 }
 0x2e7   :  { %v162_v32 = vmul.f32 %v345_v30, %v160_v31 }
 0x2e9   :  { %346 = vtanh.f32 %v162_v32 }
 0x2f3   :  { %v347_v39 = vpop.eup %346 }
 0x2f4   :  { %165 = vrot.lane.b32.xlu0 %v347_v39, %s391_s17 }
 0x366   :  { %v166_v40 = vpop.permute.xlu0 %165 }
 0x367   :  { %v168_v41 = vmul.f32 %v345_v30, %v166_v40 }
 0x369   :  { %181 = vrot.lane.b32.xlu1 %v168_v41, %s392_s18 }
 0x3db   :  { %v182_v42 = vpop.permute.xlu1 %181 }
 0x3dc   :  { %310 = vmatmul.mubr.msk.f32.vlgmr.msra.gmra.mrb[0].mxu1 %vm78_vm1, %v182_v42 }
 0x4af   :  { %v251_v44 = vpop.f32.mrb[0].mxu1 }
 0x4b0   :  { %v252_v45 = vadd.f32 %v278_v43, %v251_v44  ;;  %v311_v46 = vpop.f32.mrb[1].mxu1 }
 0x4b2   :  { %255 = vst [vmem:[#allocation6] sm:$0x3] %v252_v45 }
 0x4b3   :  { %371 = shalt.err (!%p368_p9)
}
 0x4b4   :  { %s372_s8 = scalar_lea.hbm %s494_s6, 32 }
 0x4b5   :  { %p373_p10 = scmp.ne.s32.totalorder %s494_s6, %s372_s8  ;;  %p376_p11 = scmp.lt.u32.totalorder %s372_s8, %s494_s6 }
 0x4b7   :  { %p378_p12 = pnand %p376_p11, %p373_p10 }
 0x4b9   :  { %381 = shalt.err (!%p378_p12)
}
 0x4ba   :  { %265 = dma.vmem_to_hbm [thread:$0]  %s263_s4, 32, %s494_s6, [#allocation4]  }
 0x4bb   :  { %384 = dma.done.wait [#allocation4], 32  }
 0x4bc   :  { %385 = vsyncadd [#allocation4], 4294967264 }
 0x4bd   :  { %269 = vsyncpa [#allocation4], 1 }
 0x4be   :  { %270 = vsyncpa [#allocation5], 1 }

</bundles_post_ra>
